<compile_context>
chip_gen: v7x
topology: tpu7x:2x2x1
jax: 0.10.0
libtpu: 0.0.40
codegen_flags: <defaults>
</compile_context>

<pallas_src>
import functools

import jax
import jax.numpy as jnp
from jax.experimental import pallas as pl
from jax.experimental.pallas import tpu as pltpu


def _round_up(n, m):
    return ((n + m - 1) // m) * m


def _mlp_kernel(x_ref, w1_ref, b1_ref, w2_ref, b2_ref, o_ref):
    # Layer 1: x @ W1 + b1, ReLU (f32 accumulation on the MXU).
    h = jnp.dot(x_ref[...], w1_ref[...], preferred_element_type=jnp.float32)
    h = jnp.maximum(h + b1_ref[...], 0.0)
    # Layer 2: h @ W2 + b2 (W2 / b2 are pre-padded to a lane-dense width).
    y = jnp.dot(h, w2_ref[...], preferred_element_type=jnp.float32)
    o_ref[...] = (y + b2_ref[...]).astype(o_ref.dtype)


@functools.partial(jax.jit, static_argnames=("block_b",))
def linear_qnet_forward(x, w1, b1, w2, b2, *, block_b=1024):
    """x: (B, I); w1: (I, H); b1: (1, H); w2: (H, O); b2: (1, O) -> (B, O).

    Weights are stored pre-transposed relative to PyTorch nn.Linear
    (PyTorch keeps (out, in); we keep (in, out)) so the kernel computes
    y = x @ W + b directly on the MXU.
    """
    assert block_b % 8 == 0, "block_b must be a multiple of the f32 sublane (8)"
    B, I = x.shape
    H = w1.shape[1]
    O = w2.shape[1]

    # Lane-dense output: pad O (W2 columns and b2) to a multiple of 128.
    O_pad = _round_up(max(O, 1), 128)
    w2_p = jnp.pad(w2, ((0, 0), (0, O_pad - O)))
    b2_p = jnp.pad(b2, ((0, 0), (0, O_pad - O)))

    # Batch tiling: TB is a multiple of 8, at most block_b; pad B to a multiple.
    TB = min(block_b, _round_up(B, 8))
    B_pad = _round_up(B, TB)
    x_p = jnp.pad(x, ((0, B_pad - B), (0, 0)))

    out = pl.pallas_call(
        _mlp_kernel,
        out_shape=jax.ShapeDtypeStruct((B_pad, O_pad), x.dtype),
        grid=(B_pad // TB,),
        in_specs=[
            pl.BlockSpec((TB, I), lambda i: (i, 0)),       # x: streamed per tile
            pl.BlockSpec((I, H), lambda i: (0, 0)),        # weights: VMEM-resident
            pl.BlockSpec((1, H), lambda i: (0, 0)),
            pl.BlockSpec((H, O_pad), lambda i: (0, 0)),
            pl.BlockSpec((1, O_pad), lambda i: (0, 0)),
        ],
        out_specs=pl.BlockSpec((TB, O_pad), lambda i: (i, 0)),
        compiler_params=pltpu.CompilerParams(
            dimension_semantics=("parallel",)),
    )(x_p, w1, b1, w2_p, b2_p)

    # Slice away batch padding and the lane padding of the 3-wide output.
    return out[:B, :O]


if __name__ == "__main__":
    # Shapes consistent with the Snake agent: input=11, hidden=32, output=3.
    input_size, hidden_size, output_size = 11, 32, 3

    key = jax.random.PRNGKey(0)
    kx, kw1, kb1, kw2, kb2 = jax.random.split(key, 5)

    w1 = jax.random.normal(kw1, (input_size, hidden_size), jnp.float32) * 0.1
    b1 = jax.random.normal(kb1, (1, hidden_size), jnp.float32) * 0.1
    w2 = jax.random.normal(kw2, (hidden_size, output_size), jnp.float32) * 0.1
    b2 = jax.random.normal(kb2, (1, output_size), jnp.float32) * 0.1

    def ref(xx):
        return jnp.maximum(xx @ w1 + b1, 0.0) @ w2 + b2

    # Small batch (agent-step sized): single grid step, no batch padding.
    batch = 8
    x = jax.random.normal(kx, (batch, input_size), dtype=jnp.float32)
    out = jax.block_until_ready(linear_qnet_forward(x, w1, b1, w2, b2))
    assert out.shape == (batch, output_size)
    assert jnp.allclose(out, ref(x), atol=1e-5, rtol=1e-5)

    # Ragged batch exercising the tiled multi-step grid + padding path
    # (replay-buffer style batch; block_b=256 -> grid=(3,), batch padded 520->768).
    batch2 = 520
    x2 = jax.random.normal(kx, (batch2, input_size), dtype=jnp.float32)
    out2 = jax.block_until_ready(
        linear_qnet_forward(x2, w1, b1, w2, b2, block_b=256))
    assert out2.shape == (batch2, output_size)
    assert jnp.allclose(out2, ref(x2), atol=1e-5, rtol=1e-5)

    print("KERNEL_OK")
</pallas_src>

<mosaic_0001>
module attributes {stable_mosaic.version = 11 : i64} {
  func.func @_mlp_kernel(%arg0: i32, %arg1: memref<8x11xf32, #tpu.memory_space<vmem>>, %arg2: memref<11x32xf32, #tpu.memory_space<vmem>>, %arg3: memref<1x32xf32, #tpu.memory_space<vmem>>, %arg4: memref<32x128xf32, #tpu.memory_space<vmem>>, %arg5: memref<1x128xf32, #tpu.memory_space<vmem>>, %arg6: memref<8x128xf32, #tpu.memory_space<vmem>>) attributes {dimension_semantics = [#tpu.dimension_semantics<parallel>], iteration_bounds = array<i64: 1>, scalar_prefetch = 0 : i64, scratch_operands = 0 : i64, tpu.core_type = #tpu.core_type<tc>, window_params = [{transform_indices = @transform_0, window_bounds = array<i64: 8, 11>}, {pipeline_mode = #tpu.pipeline_mode<synchronous>, transform_indices = @transform_1, window_bounds = array<i64: 11, 32>}, {pipeline_mode = #tpu.pipeline_mode<synchronous>, transform_indices = @transform_2, window_bounds = array<i64: 1, 32>}, {pipeline_mode = #tpu.pipeline_mode<synchronous>, transform_indices = @transform_3, window_bounds = array<i64: 32, 128>}, {pipeline_mode = #tpu.pipeline_mode<synchronous>, transform_indices = @transform_4, window_bounds = array<i64: 1, 128>}, {transform_indices = @transform_5, window_bounds = array<i64: 8, 128>}]} {
    %c0 = arith.constant 0 : index
    %c0_0 = arith.constant 0 : index
    %0 = vector.load %arg1[%c0, %c0_0] : memref<8x11xf32, #tpu.memory_space<vmem>>, vector<8x11xf32>
    %c0_1 = arith.constant 0 : index
    %c0_2 = arith.constant 0 : index
    %1 = vector.load %arg2[%c0_1, %c0_2] : memref<11x32xf32, #tpu.memory_space<vmem>>, vector<11x32xf32>
    %cst = arith.constant dense<0.000000e+00> : vector<8x32xf32>
    %2 = tpu.matmul %0, %1, %cst {dimension_numbers = #tpu.dot_dimension_numbers<[1], [0], [0], [1], [0, 0, 1, 1], [], []>} : vector<8x11xf32>, vector<11x32xf32>, vector<8x32xf32> -> vector<8x32xf32>
    %c0_3 = arith.constant 0 : index
    %c0_4 = arith.constant 0 : index
    %3 = vector.load %arg3[%c0_3, %c0_4] : memref<1x32xf32, #tpu.memory_space<vmem>>, vector<1x32xf32>
    %4 = vector.broadcast %3 : vector<1x32xf32> to vector<8x32xf32>
    %5 = arith.addf %2, %4 : vector<8x32xf32>
    %cst_5 = arith.constant 0.000000e+00 : f32
    %6 = vector.broadcast %cst_5 : f32 to vector<8x32xf32>
    %7 = arith.maximumf %5, %6 : vector<8x32xf32>
    %c0_6 = arith.constant 0 : index
    %c0_7 = arith.constant 0 : index
    %8 = vector.load %arg4[%c0_6, %c0_7] : memref<32x128xf32, #tpu.memory_space<vmem>>, vector<32x128xf32>
    %cst_8 = arith.constant dense<0.000000e+00> : vector<8x128xf32>
    %9 = tpu.matmul %7, %8, %cst_8 {dimension_numbers = #tpu.dot_dimension_numbers<[1], [0], [0], [1], [0, 0, 1, 1], [], []>} : vector<8x32xf32>, vector<32x128xf32>, vector<8x128xf32> -> vector<8x128xf32>
    %c0_9 = arith.constant 0 : index
    %c0_10 = arith.constant 0 : index
    %10 = vector.load %arg5[%c0_9, %c0_10] : memref<1x128xf32, #tpu.memory_space<vmem>>, vector<1x128xf32>
    %11 = vector.broadcast %10 : vector<1x128xf32> to vector<8x128xf32>
    %12 = arith.addf %9, %11 : vector<8x128xf32>
    %c0_11 = arith.constant 0 : index
    %c0_12 = arith.constant 0 : index
    %13 = vector.load %arg6[%c0_11, %c0_12] : memref<8x128xf32, #tpu.memory_space<vmem>>, vector<8x128xf32>
    tpu.vector_store %arg6[%c0_11, %c0_12], %12 {strides = array<i32>} : memref<8x128xf32, #tpu.memory_space<vmem>>, vector<8x128xf32>,
    return
  }
  func.func @transform_0(%arg0: i32) -> (i32, i32) {
    %c0_i32 = arith.constant 0 : i32
    %c0_i32_0 = arith.constant 0 : i32
    return %arg0, %c0_i32 : i32, i32
  }
  func.func @transform_1(%arg0: i32) -> (i32, i32) {
    %c0_i32 = arith.constant 0 : i32
    %c0_i32_0 = arith.constant 0 : i32
    %c0_i32_1 = arith.constant 0 : i32
    return %c0_i32, %c0_i32_0 : i32, i32
  }
  func.func @transform_2(%arg0: i32) -> (i32, i32) {
    %c0_i32 = arith.constant 0 : i32
    %c0_i32_0 = arith.constant 0 : i32
    %c0_i32_1 = arith.constant 0 : i32
    return %c0_i32, %c0_i32_0 : i32, i32
  }
  func.func @transform_3(%arg0: i32) -> (i32, i32) {
    %c0_i32 = arith.constant 0 : i32
    %c0_i32_0 = arith.constant 0 : i32
    %c0_i32_1 = arith.constant 0 : i32
    return %c0_i32, %c0_i32_0 : i32, i32
  }
  func.func @transform_4(%arg0: i32) -> (i32, i32) {
    %c0_i32 = arith.constant 0 : i32
    %c0_i32_0 = arith.constant 0 : i32
    %c0_i32_1 = arith.constant 0 : i32
    return %c0_i32, %c0_i32_0 : i32, i32
  }
  func.func @transform_5(%arg0: i32) -> (i32, i32) {
    %c0_i32 = arith.constant 0 : i32
    %c0_i32_0 = arith.constant 0 : i32
    return %arg0, %c0_i32 : i32, i32
  }
}

</mosaic_0001>

<bundles_post_ra>
// kernel: linear_qnet_forward.1
= control target key start
LH: loop header
LB: loop body
LE: loop exit
PB: predicated region body
PF: predicated region fallthrough
CT: control target
= control target key end

     0   :  { %vm34_vm0 = vcmask 1042432   ;;  %v244_v0 = vmov 0.0|0.0   ;;  %vm245_vm1 = vmmov 1   ;;  %vm246_vm3 = vmmov 0   ;;  %s308_s1 = inlined_call_operand.vmem [shape: f32[11,32], index: 1, kind: input, shape index: {}]   ;;  %s309_s3 = inlined_call_operand.vmem [shape: f32[32,128], index: 3, kind: input, shape index: {}]   ;;  %s310_s0 = inlined_call_operand.vmem [shape: f32[8,11], index: 0, kind: input, shape index: {}]   ;;  %s311_s2 = inlined_call_operand.vmem [shape: f32[1,32], index: 2, kind: input, shape index: {}]   ;;  %s312_s4 = inlined_call_operand.vmem [shape: f32[1,128], index: 4, kind: input, shape index: {}]   ;;  %s313_s5 = inlined_call_operand.vmem [shape: f32[8,128], index: 5, kind: output, shape index: {}]  }
   0x1   :  { %230 = vmatprep.subr.bf16.mxu0 %v244_v0  ;;  %v21_v1 = vld [vmem:[%s308_s1] sm:$0xff]  ;;  %v22_v2 = vld [vmem:[%s308_s1 + $0x8] sm:$0x7]  ;;  %vm232_vm2 = vmpackc.low %vm34_vm0, %vm245_vm1  ;;  %234 = vmatprep.subr.bf16.mxu1 %v244_v0  ;;  %v247_v4 = vmov 0.0   ;;  %vm30_vm4 = vcmask 89088   ;;  %vm120_vm5 = vcmask 261120  }
   0x2   :  { %v231_v3 = vpack.c.bf16 %v22_v2, %v21_v1  ;;  %216 = vmatprep.mubr.msk.f32.mxu0 %vm246_vm3, %v247_v4  ;;  %v109_v5 = vld [vmem:[%s309_s3] sm:$0xff]  ;;  %v110_v6 = vld [vmem:[%s309_s3 + $0x8] sm:$0xff]  ;;  %227 = vmatprep.mubr.msk.f32.mxu1 %vm246_vm3, %v247_v4  ;;  %v111_v9 = vld [vmem:[%s309_s3 + $0x10] sm:$0xff] }
   0x3   :  { %v235_v7 = vpack.c.bf16 %v110_v6, %v109_v5  ;;  %v20_v8 = vld [vmem:[%s310_s0] sm:$0xff]  ;;  %v112_v10 = vld [vmem:[%s309_s3 + $0x18] sm:$0xff] }
   0x4   :  { %233 = vmatpush3.bf16.msk.msra.mxu0 %vm232_vm2, %v231_v3  ;;  %v238_v11 = vpack.c.bf16 %v112_v10, %v111_v9  ;;  %v199_v12 = vld [vmem:[%s311_s2] ss:$0 sm:$0xff] }
   0x5   :  { %236 = vmatpush3.bf16.msra.mxu1 %v235_v7  ;;  %v202_v17 = vld [vmem:[%s312_s4] ss:$0 sm:$0xff] }
   0x6   :  { %237 = vmatprep.subr.bf16.mxu1 %v244_v0 }
   0x7   :  { %217 = vmatmul.mubr.msk.f32.vlgmr.msra.gmra.mrb[0].mxu0 %vm30_vm4, %v20_v8 }
   0x9   :  { %239 = vmatpush3.bf16.msra.mxu1 %v238_v11 }
  0xda   :  { %v104_v13 = vpop.f32.mrb[0].mxu0 }
  0xdb   :  { %v105_v14 = vadd.f32 %v199_v12, %v104_v13  ;;  %v218_v15 = vpop.f32.mrb[1].mxu0 }
  0xdd   :  { %v108_v16 = vmax.f32 %v105_v14, 0.0 }
  0xdf   :  { %228 = vmatmul.mubr.msk.f32.vlgmr.msra.gmra.mrb[0].mxu1 %vm120_vm5, %v108_v16 }
 0x1b2   :  { %v190_v18 = vpop.f32.mrb[0].mxu1 }
 0x1b3   :  { %v191_v19 = vadd.f32 %v202_v17, %v190_v18  ;;  %v229_v20 = vpop.f32.mrb[1].mxu1 }
 0x1b5   :  { %194 = vst [vmem:[%s313_s5] sm:$0xff] %v191_v19 }

</bundles_post_ra>
